<compile_context>
chip_gen: v6e
topology: v6e:2x2x1
jax: 0.10.0
libtpu: 0.0.40
codegen_flags: <defaults>
</compile_context>

<pallas_src>
from functools import partial

import jax
import jax.numpy as jnp
import numpy as np
from jax.experimental import pallas as pl
from jax.experimental.pallas import tpu as pltpu


def _fcu_up_kernel(x_ref, w_ref, b_ref, up_ref, out_ref):
    """Fused conv1x1(+folded BN) + ReLU + nearest-upsample for one image.

    x_ref  : (HW, Cin)    spatial tokens, token-major (CLS already dropped)
    w_ref  : (Cout, Cin)  1x1-conv weight with eval-mode BN scale folded in
    b_ref  : (Cout, 1)    conv bias with BN shift folded in
    up_ref : (HW, HWup)   0/1 nearest-neighbor expansion matrix
    out_ref: (Cout, HWup) NCHW output with spatial dims flattened (lane-dense)
    """
    # conv1x1: (Cout,Cin) @ (Cin,HW). The token->channel transpose is absorbed
    # into the matmul operand (MXU handles the transposed contraction) instead
    # of a separate XLA copy kernel in the wrapper.
    y = jnp.dot(w_ref[...], x_ref[...].T, preferred_element_type=jnp.float32)
    y = jnp.maximum(y + b_ref[...], 0.0)          # folded-BN bias + ReLU (VPU)
    # Nearest-neighbor upsample as a second MXU matmul against a constant
    # one-hot matrix -> output stays channel-major and lane-dense.
    out = jnp.dot(y, up_ref[...], preferred_element_type=jnp.float32)
    out_ref[...] = out.astype(out_ref.dtype)


def _nearest_upsample_matrix(H, W, s):
    """(HW, H*s*W*s) one-hot matrix: S[p_in, p_out] = 1 iff output pixel p_out
    maps back to input pixel p_in under nearest-neighbor upsampling by s."""
    rows = np.arange(H * s) // s                                      # (H*s,)
    cols = np.arange(W * s) // s                                      # (W*s,)
    src = (rows[:, None] * W + cols[None, :]).reshape(-1)             # (HWup,)
    return (np.arange(H * W)[:, None] == src[None, :]).astype(np.float32)


@partial(jax.jit, static_argnames=("H", "W", "up_stride", "eps"))
def fcu_up_pallas(x, conv_w, conv_b, bn_gamma, bn_beta, bn_mean, bn_var,
                  *, H, W, up_stride, eps=1e-6):
    B, N, Cin = x.shape
    assert N == H * W + 1, "expects a CLS token followed by H*W spatial tokens"
    Cout = conv_w.shape[0]
    s = up_stride
    HW = H * W
    HWup = (H * s) * (W * s)

    # ---- wrapper-side folding (fused / constant-folded under jit) -----------
    # bn(conv(x)) = scale * (W x + b - mean) + beta,  scale = gamma/sqrt(var+eps)
    scale = bn_gamma / jnp.sqrt(bn_var + eps)                          # (Cout,)
    w_eff = (conv_w.reshape(Cout, Cin) * scale[:, None]).astype(jnp.float32)
    b_eff = (scale * (conv_b - bn_mean) + bn_beta).reshape(Cout, 1).astype(
        jnp.float32)

    # Drop the CLS token only (contiguous copy); no wrapper-side transpose —
    # the channel-major transpose happens inside the kernel's first matmul.
    x_sp = x[:, 1:, :].astype(jnp.float32)                            # (B,HW,Cin)

    # Host-built constant expansion matrix, baked into the jitted executable.
    up_mat = jnp.asarray(_nearest_upsample_matrix(H, W, s))           # (HW,HWup)

    out_flat = pl.pallas_call(
        _fcu_up_kernel,
        out_shape=jax.ShapeDtypeStruct((B, Cout, HWup), x.dtype),
        grid_spec=pltpu.PrefetchScalarGridSpec(
            num_scalar_prefetch=0,
            grid=(B,),
            in_specs=[
                pl.BlockSpec((pl.Squeezed(), HW, Cin), lambda b: (b, 0, 0)),  # x
                pl.BlockSpec((Cout, Cin), lambda b: (0, 0)),                  # w
                pl.BlockSpec((Cout, 1), lambda b: (0, 0)),                    # b
                pl.BlockSpec((HW, HWup), lambda b: (0, 0)),                   # S
            ],
            out_specs=pl.BlockSpec((pl.Squeezed(), Cout, HWup),
                                   lambda b: (b, 0, 0)),
        ),
        compiler_params=pltpu.CompilerParams(
            dimension_semantics=("parallel",)),
    )(x_sp, w_eff, b_eff, up_mat)

    # Free contiguous reshape back to NCHW.
    return out_flat.reshape(B, Cout, H * s, W * s)


def fcu_up_reference(x, conv_w, conv_b, bn_gamma, bn_beta, bn_mean, bn_var,
                     *, H, W, up_stride, eps=1e-6):
    """Pure-JAX reference mirroring the PyTorch module (eval-mode BN)."""
    B, N, C = x.shape
    Cout = conv_w.shape[0]
    x_r = jnp.transpose(x[:, 1:, :], (0, 2, 1)).reshape(B, C, H, W)
    y = jnp.einsum('bchw,oc->bohw', x_r, conv_w.reshape(Cout, C))
    y = y + conv_b[None, :, None, None]
    y = (y - bn_mean[None, :, None, None]) / jnp.sqrt(
        bn_var[None, :, None, None] + eps)
    y = y * bn_gamma[None, :, None, None] + bn_beta[None, :, None, None]
    y = jnp.maximum(y, 0.0)
    y = jnp.repeat(jnp.repeat(y, up_stride, axis=2), up_stride, axis=3)
    return y


if __name__ == "__main__":
    # Small deterministic problem: B=2, H=W=16 (N=257 tokens), Cin=64 -> Cout=32,
    # up_stride=2  =>  output (2, 32, 32, 32).
    B, H, W = 2, 16, 16
    Cin, Cout, up_stride = 64, 32, 2
    N = H * W + 1

    key = jax.random.PRNGKey(0)
    ks = jax.random.split(key, 7)
    x = jax.random.normal(ks[0], (B, N, Cin), dtype=jnp.float32)
    conv_w = jax.random.normal(ks[1], (Cout, Cin, 1, 1), dtype=jnp.float32) * 0.05
    conv_b = jax.random.normal(ks[2], (Cout,), dtype=jnp.float32) * 0.05
    bn_gamma = 1.0 + 0.1 * jax.random.normal(ks[3], (Cout,), dtype=jnp.float32)
    bn_beta = 0.1 * jax.random.normal(ks[4], (Cout,), dtype=jnp.float32)
    bn_mean = 0.1 * jax.random.normal(ks[5], (Cout,), dtype=jnp.float32)
    bn_var = 0.5 + jnp.abs(jax.random.normal(ks[6], (Cout,), dtype=jnp.float32))

    out = fcu_up_pallas(x, conv_w, conv_b, bn_gamma, bn_beta, bn_mean, bn_var,
                        H=H, W=W, up_stride=up_stride)
    out = jax.block_until_ready(out)

    ref = fcu_up_reference(x, conv_w, conv_b, bn_gamma, bn_beta, bn_mean, bn_var,
                           H=H, W=W, up_stride=up_stride)
    np.testing.assert_allclose(np.asarray(out), np.asarray(ref),
                               rtol=1e-4, atol=1e-4)

    print("KERNEL_OK")
</pallas_src>

<mosaic_0001>
module attributes {stable_mosaic.version = 11 : i64} {
  func.func @_fcu_up_kernel(%arg0: i32, %arg1: memref<1x256x64xf32, #tpu.memory_space<vmem>>, %arg2: memref<32x64xf32, #tpu.memory_space<vmem>>, %arg3: memref<32x1xf32, #tpu.memory_space<vmem>>, %arg4: memref<256x1024xf32, #tpu.memory_space<vmem>>, %arg5: memref<1x32x1024xf32, #tpu.memory_space<vmem>>) attributes {dimension_semantics = [#tpu.dimension_semantics<parallel>], iteration_bounds = array<i64: 2>, scalar_prefetch = 0 : i64, scratch_operands = 0 : i64, tpu.core_type = #tpu.core_type<tc>, window_params = [{transform_indices = @transform_0, window_bounds = array<i64: 1, 256, 64>}, {pipeline_mode = #tpu.pipeline_mode<synchronous>, transform_indices = @transform_1, window_bounds = array<i64: 32, 64>}, {pipeline_mode = #tpu.pipeline_mode<synchronous>, transform_indices = @transform_2, window_bounds = array<i64: 32, 1>}, {pipeline_mode = #tpu.pipeline_mode<synchronous>, transform_indices = @transform_3, window_bounds = array<i64: 256, 1024>}, {transform_indices = @transform_4, window_bounds = array<i64: 1, 32, 1024>}]} {
    %c0 = arith.constant 0 : index
    %c0_0 = arith.constant 0 : index
    %0 = vector.load %arg2[%c0, %c0_0] : memref<32x64xf32, #tpu.memory_space<vmem>>, vector<32x64xf32>
    %c0_1 = arith.constant 0 : index
    %c0_2 = arith.constant 0 : index
    %c0_3 = arith.constant 0 : index
    %1 = vector.load %arg1[%c0_1, %c0_2, %c0_3] : memref<1x256x64xf32, #tpu.memory_space<vmem>>, vector<1x256x64xf32>
    %2 = vector.shape_cast %1 : vector<1x256x64xf32> to vector<256x64xf32>
    %3 = tpu.transpose %2, [1, 0] : vector<256x64xf32> -> vector<64x256xf32>
    %cst = arith.constant dense<0.000000e+00> : vector<32x256xf32>
    %4 = tpu.matmul %0, %3, %cst {dimension_numbers = #tpu.dot_dimension_numbers<[1], [0], [0], [1], [0, 0, 1, 1], [], []>} : vector<32x64xf32>, vector<64x256xf32>, vector<32x256xf32> -> vector<32x256xf32>
    %c0_4 = arith.constant 0 : index
    %c0_5 = arith.constant 0 : index
    %5 = vector.load %arg3[%c0_4, %c0_5] : memref<32x1xf32, #tpu.memory_space<vmem>>, vector<32x1xf32>
    %6 = vector.broadcast %5 : vector<32x1xf32> to vector<32x256xf32>
    %7 = arith.addf %4, %6 : vector<32x256xf32>
    %cst_6 = arith.constant 0.000000e+00 : f32
    %8 = vector.broadcast %cst_6 : f32 to vector<32x256xf32>
    %9 = arith.maximumf %7, %8 : vector<32x256xf32>
    %c0_7 = arith.constant 0 : index
    %c0_8 = arith.constant 0 : index
    %10 = vector.load %arg4[%c0_7, %c0_8] : memref<256x1024xf32, #tpu.memory_space<vmem>>, vector<256x1024xf32>
    %cst_9 = arith.constant dense<0.000000e+00> : vector<32x1024xf32>
    %11 = tpu.matmul %9, %10, %cst_9 {dimension_numbers = #tpu.dot_dimension_numbers<[1], [0], [0], [1], [0, 0, 1, 1], [], []>} : vector<32x256xf32>, vector<256x1024xf32>, vector<32x1024xf32> -> vector<32x1024xf32>
    %c0_10 = arith.constant 0 : index
    %c0_11 = arith.constant 0 : index
    %c0_12 = arith.constant 0 : index
    %12 = vector.load %arg5[%c0_10, %c0_11, %c0_12] : memref<1x32x1024xf32, #tpu.memory_space<vmem>>, vector<1x32x1024xf32>
    %13 = vector.shape_cast %12 : vector<1x32x1024xf32> to vector<32x1024xf32>
    %14 = vector.shape_cast %11 : vector<32x1024xf32> to vector<1x32x1024xf32>
    tpu.vector_store %arg5[%c0_10, %c0_11, %c0_12], %14 {strides = array<i32>} : memref<1x32x1024xf32, #tpu.memory_space<vmem>>, vector<1x32x1024xf32>,
    return
  }
  func.func @transform_0(%arg0: i32) -> (i32, i32, i32) {
    %c0_i32 = arith.constant 0 : i32
    %c0_i32_0 = arith.constant 0 : i32
    %c0_i32_1 = arith.constant 0 : i32
    return %arg0, %c0_i32, %c0_i32_0 : i32, i32, i32
  }
  func.func @transform_1(%arg0: i32) -> (i32, i32) {
    %c0_i32 = arith.constant 0 : i32
    %c0_i32_0 = arith.constant 0 : i32
    %c0_i32_1 = arith.constant 0 : i32
    return %c0_i32, %c0_i32_0 : i32, i32
  }
  func.func @transform_2(%arg0: i32) -> (i32, i32) {
    %c0_i32 = arith.constant 0 : i32
    %c0_i32_0 = arith.constant 0 : i32
    %c0_i32_1 = arith.constant 0 : i32
    return %c0_i32, %c0_i32_0 : i32, i32
  }
  func.func @transform_3(%arg0: i32) -> (i32, i32) {
    %c0_i32 = arith.constant 0 : i32
    %c0_i32_0 = arith.constant 0 : i32
    %c0_i32_1 = arith.constant 0 : i32
    return %c0_i32, %c0_i32_0 : i32, i32
  }
  func.func @transform_4(%arg0: i32) -> (i32, i32, i32) {
    %c0_i32 = arith.constant 0 : i32
    %c0_i32_0 = arith.constant 0 : i32
    %c0_i32_1 = arith.constant 0 : i32
    return %arg0, %c0_i32, %c0_i32_0 : i32, i32, i32
  }
}

</mosaic_0001>

<bundles_post_ra>
// kernel: fcu_up_pallas.1
= control target key start
LH: loop header
LB: loop body
LE: loop exit
PB: predicated region body
PF: predicated region fallthrough
CT: control target
= control target key end

     0   :  { %9 = vsyncpa [#allocation3], 0  ;;  %s1436_s15 = smov 0   ;;  %s1922_s0 = inlined_call_operand.vmem [shape: f32[2,256,64], index: 0, kind: input, shape index: {}]   ;;  %s1923_s1 = inlined_call_operand.vmem [shape: f32[32,64], index: 1, kind: input, shape index: {}]   ;;  %s1924_s2 = inlined_call_operand.vmem [shape: f32[32,1], index: 2, kind: input, shape index: {}]   ;;  %s1925_s3 = inlined_call_operand.hbm [shape: f32[256,1024], index: 3, kind: input, shape index: {}]   ;;  %s1926_s4 = inlined_call_operand.vmem [shape: f32[2,32,1024], index: 4, kind: output, shape index: {}]  }
   0x1 LB: > { %s1442_s16 = sadd.s32 4294967295, %s1405_s15   ;;  %p1192_p0 = scmp.ge.s32.totalorder %s1405_s15, 1  ;;  %s1405_s15 = sphi %s1436_s15, %s15_s15  }
   0x2   : > { %p135_p1 = scmp.lt.s32.totalorder %s1405_s15, 3  ;;  %s1407_s17 = smov [#allocation2]  }
   0x3   : > { %s153_s18 = sshll.u32 %s1407_s17, 4  ;;  %p1353_p3 = scmp.eq.s32.totalorder %s1442_s16, 0  ;;  %s154_s18 = int_to_ptr.vmem [resolvable:$true] %s153_s18 }
   0x4   : > { %p1446_p2 = pnand %p1192_p0, %p135_p1  ;;  %s1380_s20 = scalar_lea.vmem %s154_s18, 32768 }
   0x5   : > { %p1381_p7 = scmp.ne.s32.totalorder %s154_s18, %s1380_s20  ;;  %p1388_p10 = scmp.lt.s32.totalorder %s154_s18, %s154_s18 }
   0x6   : > { %p1349_p4 = pneg %p1446_p2  ;;  %p1389_p11 = scmp.lt.s32.totalorder %s1380_s20, %s1380_s20 }
   0x8   : > { %p1350_p5 = pnand %p1353_p3, %p1349_p4  ;;  %p1390_p12 = por %p1389_p11, %p1388_p10 }
   0xa   : > { %p1371_p6 = pneg %p1350_p5 }
   0xc   : > { %p1383_p8 = pnand %p1381_p7, %p1371_p6 }
   0xe   : > { %p1384_p9 = pneg %p1383_p8 }
  0x10   : > { %p1391_p13 = pnand %p1390_p12, %p1384_p9 }
  0x12   : > { %1394 = shalt.err (!%p1391_p13)
}
  0x13   : > { %s1408_s21 = smov 1024   ;;  %s1409_s22 = smov 64  }
  0x14   : > { %1352 = dma.hbm_to_vmem [thread:$0]  (!%p1350_p5), %s1925_s3, 32768, %s154_s18, [#allocation3], %s1408_s21, %s1408_s21, %s1409_s22  }
  0x15   : > { %177 = sbr.rel (%p1446_p2) target bundleno = 634 (0x27a), region = 36 }
  0x1a   : > { %1400 = dma.done.wait (%p1353_p3), [#allocation3], 32768  }
  0x1b   : > { %1402 = vsyncadd (%p1353_p3), [#allocation3], 4294934528  ;;  %p203_p0 = scmp.lt.s32.totalorder %s1442_s16, 1  ;;  %v1410_v0 = vmov 0   ;;  %vm273_vm0 = vcmask 523264   ;;  %v1492_v8 = vld [vmem:[%s1923_s1] sm:$0xff] }
  0x1c   : > { %1367 = vset.pattern.permute.xlu0 %v1410_v0  ;;  %1368 = vset.pattern.permute.xlu1 %v1410_v0  ;;  %v249_v11 = vld [vmem:[%s1924_s2] sm:$0xff]  ;;  %v251_v12 = vld [vmem:[%s1924_s2 + $0x10] sm:$0xff]  ;;  %v250_v13 = vld [vmem:[%s1924_s2 + $0x8] sm:$0xff] }
  0x1d   : > { %s1968_s16 = smov (!%p203_p0, %s1442_s16), 1  ;;  %1273 = vmatprep.mubr.msk.f32.mxu0 %vm273_vm0, %v1492_v8  ;;  %255 = vperm.xlu0 %1367, %v249_v11   ;;  %v600_v14 = vld [vmem:[#allocation2 + $0x3c8] sm:$0xff]  ;;  %v252_v15 = vld [vmem:[%s1924_s2 + $0x18] sm:$0xff]  ;;  %v599_v16 = vld [vmem:[#allocation2 + $0x3c0] sm:$0xff] }
  0x1e   : > { %s1239_s25 = sshll.u32 %s1968_s16, 8  ;;  %265 = vperm.xlu1 %1368, %v251_v12   ;;  %735 = vmatprep.subr.mxu1 %v600_v14  ;;  %v592_v17 = vld [vmem:[#allocation2 + $0x388] sm:$0xff]  ;;  %v591_v19 = vld [vmem:[#allocation2 + $0x380] sm:$0xff] }
  0x1f   : > { %s1474_s28 = scalar_lea.vmem %s1922_s0, %s1239_s25  ;;  %736 = vmatpush1.msra.mxu1 %v599_v16  ;;  %v584_v21 = vld [vmem:[#allocation2 + $0x348] sm:$0xff]  ;;  %v583_v22 = vld [vmem:[#allocation2 + $0x340] sm:$0xff]  ;;  %s1885_s23 = scalar_lea.vmem %s1926_s4, %s1239_s25 }
  0x20   : > { %v248_v1 = vld [vmem:[%s1474_s28 + $0xf8] sm:$0xff]  ;;  %v247_v3 = vld [vmem:[%s1474_s28 + $0xf0] sm:$0xff]  ;;  %v246_v5 = vld [vmem:[%s1474_s28 + $0xe8] sm:$0xff]  ;;  %737 = vmatprep.subr.mxu1 %v592_v17 }
  0x21   : > { %v232_v2 = vld [vmem:[%s1474_s28 + $0x78] sm:$0xff]  ;;  %1241 = vmatprep.subr.msk.mxu0 %vm273_vm0, %v248_v1  ;;  %v231_v4 = vld [vmem:[%s1474_s28 + $0x70] sm:$0xff]  ;;  %v230_v6 = vld [vmem:[%s1474_s28 + $0x68] sm:$0xff]  ;;  %260 = vperm.xlu0 %1367, %v250_v13  }
  0x22   : > { %1242 = vmatpush3.xpose.msk.msra.mxu0 %vm273_vm0, %v232_v2  ;;  %v245_v7 = vld [vmem:[%s1474_s28 + $0xe0] sm:$0xff]  ;;  %v244_v10 = vld [vmem:[%s1474_s28 + $0xd8] sm:$0xff]  ;;  %v243_v20 = vld [vmem:[%s1474_s28 + $0xd0] sm:$0xff]  ;;  %270 = vperm.xlu1 %1368, %v252_v15  }
  0x23   : > { %1243 = vmatprep.subr.msk.mxu0 %vm273_vm0, %v247_v3  ;;  %v229_v9 = vld [vmem:[%s1474_s28 + $0x60] sm:$0xff]  ;;  %v228_v18 = vld [vmem:[%s1474_s28 + $0x58] sm:$0xff]  ;;  %738 = vmatpush1.msra.mxu1 %v591_v19  ;;  %v576_v23 = vld [vmem:[#allocation2 + $0x308] sm:$0xff] }
  0x24   : > { %v227_v24 = vld [vmem:[%s1474_s28 + $0x50] sm:$0xff]  ;;  %739 = vmatprep.subr.mxu1 %v584_v21  ;;  %v575_v25 = vld [vmem:[#allocation2 + $0x300] sm:$0xff]  ;;  %v242_v26 = vld [vmem:[%s1474_s28 + $0xc8] sm:$0xff] }
  0x25   : > { %740 = vmatpush1.msra.mxu1 %v583_v22  ;;  %v568_v27 = vld [vmem:[#allocation2 + $0x2c8] sm:$0xff]  ;;  %v567_v28 = vld [vmem:[#allocation2 + $0x2c0] sm:$0xff]  ;;  %v240_v38 = vld [vmem:[%s1474_s28 + $0xb8] sm:$0xff] }
  0x26   : > { %1244 = vmatpush3.xpose.msk.msra.mxu0 %vm273_vm0, %v231_v4  ;;  %741 = vmatprep.subr.mxu1 %v576_v23  ;;  %v560_v29 = vld [vmem:[#allocation2 + $0x288] sm:$0xff]  ;;  %v559_v31 = vld [vmem:[#allocation2 + $0x280] sm:$0xff]  ;;  %v224_v42 = vld [vmem:[%s1474_s28 + $0x38] sm:$0xff] }
  0x27   : > { %1245 = vmatprep.subr.msk.mxu0 %vm273_vm0, %v246_v5  ;;  %742 = vmatpush1.msra.mxu1 %v575_v25  ;;  %v226_v30 = vld [vmem:[%s1474_s28 + $0x48] sm:$0xff]  ;;  %v241_v32 = vld [vmem:[%s1474_s28 + $0xc0] sm:$0xff]  ;;  %v239_v44 = vld [vmem:[%s1474_s28 + $0xb0] sm:$0xff] }
  0x28   : > { %743 = vmatprep.subr.mxu1 %v568_v27  ;;  %v552_v33 = vld [vmem:[#allocation2 + $0x248] sm:$0xff]  ;;  %v551_v34 = vld [vmem:[#allocation2 + $0x240] sm:$0xff]  ;;  %v223_v48 = vld [vmem:[%s1474_s28 + $0x30] sm:$0xff] }
  0x29   : > { %744 = vmatpush1.msra.mxu1 %v567_v28  ;;  %v544_v35 = vld [vmem:[#allocation2 + $0x208] sm:$0xff]  ;;  %v225_v36 = vld [vmem:[%s1474_s28 + $0x40] sm:$0xff]  ;;  %v236_v62 = vld [vmem:[%s1474_s28 + $0x98] sm:$0xff] }
  0x2a   : > { %1246 = vmatpush3.xpose.msk.msra.mxu0 %vm273_vm0, %v230_v6  ;;  %745 = vmatprep.subr.mxu1 %v560_v29  ;;  %v543_v37 = vld [vmem:[#allocation2 + $0x200] sm:$0xff]  ;;  %v536_v39 = vld [vmem:[#allocation2 + $0x1c8] sm:$0xff]  ;;  %v220_v2 = vld [vmem:[%s1474_s28 + $0x18] sm:$0xff] }
  0x2b   : > { %1247 = vmatprep.subr.msk.mxu0 %vm273_vm0, %v245_v7  ;;  %746 = vmatpush1.msra.mxu1 %v559_v31  ;;  %v535_v40 = vld [vmem:[#allocation2 + $0x1c0] sm:$0xff]  ;;  %v528_v41 = vld [vmem:[#allocation2 + $0x188] sm:$0xff]  ;;  %v235_v4 = vld [vmem:[%s1474_s28 + $0x90] sm:$0xff] }
  0x2c   : > { %747 = vmatprep.subr.mxu1 %v552_v33  ;;  %v527_v43 = vld [vmem:[#allocation2 + $0x180] sm:$0xff]  ;;  %v520_v45 = vld [vmem:[#allocation2 + $0x148] sm:$0xff]  ;;  %v602_v23 = vld [vmem:[#allocation2 + $0x3d8] sm:$0xff] }
  0x2d   : > { %748 = vmatpush1.msra.mxu1 %v551_v34  ;;  %v519_v46 = vld [vmem:[#allocation2 + $0x140] sm:$0xff]  ;;  %v512_v47 = vld [vmem:[#allocation2 + $0x108] sm:$0xff]  ;;  %v601_v28 = vld [vmem:[#allocation2 + $0x3d0] sm:$0xff] }
  0x2e   : > { %1248 = vmatpush3.xpose.msk.msra.mxu0 %vm273_vm0, %v229_v9  ;;  %749 = vmatprep.subr.mxu1 %v544_v35  ;;  %v511_v49 = vld [vmem:[#allocation2 + $0x100] sm:$0xff]  ;;  %v238_v50 = vld [vmem:[%s1474_s28 + $0xa8] sm:$0xff]  ;;  %v219_v9 = vld [vmem:[%s1474_s28 + $0x10] sm:$0xff] }
  0x2f   : > { %1249 = vmatprep.subr.msk.mxu0 %vm273_vm0, %v244_v10  ;;  %750 = vmatpush1.msra.mxu1 %v543_v37  ;;  %v504_v51 = vld [vmem:[#allocation2 + $0xc8] sm:$0xff]  ;;  %v503_v52 = vld [vmem:[#allocation2 + $0xc0] sm:$0xff]  ;;  %v594_v29 = vld [vmem:[#allocation2 + $0x398] sm:$0xff] }
  0x30   : > { %751 = vmatprep.subr.mxu1 %v536_v39  ;;  %v496_v53 = vld [vmem:[#allocation2 + $0x88] sm:$0xff]  ;;  %v495_v55 = vld [vmem:[#allocation2 + $0x80] sm:$0xff]  ;;  %v593_v31 = vld [vmem:[#allocation2 + $0x390] sm:$0xff] }
  0x31   : > { %752 = vmatpush1.msra.mxu1 %v535_v40  ;;  %v222_v54 = vld [vmem:[%s1474_s28 + $0x28] sm:$0xff]  ;;  %v237_v56 = vld [vmem:[%s1474_s28 + $0xa0] sm:$0xff]  ;;  %v586_v33 = vld [vmem:[#allocation2 + $0x358] sm:$0xff] }
  0x32   : > { %1250 = vmatpush3.xpose.msk.msra.mxu0 %vm273_vm0, %v228_v18  ;;  %753 = vmatprep.subr.mxu1 %v528_v41  ;;  %v488_v57 = vld [vmem:[#allocation2 + $0x48] sm:$0xff]  ;;  %v487_v58 = vld [vmem:[#allocation2 + $0x40] sm:$0xff]  ;;  %v215_v34 = vld [vmem:[%s1923_s1 + $0x10] sm:$0xff] }
  0x33   : > { %1251 = vmatprep.subr.msk.mxu0 %vm273_vm0, %v243_v20  ;;  %754 = vmatpush1.msra.mxu1 %v527_v43  ;;  %v480_v59 = vld [vmem:[#allocation2 + $0x8] sm:$0xff]  ;;  %v221_v60 = vld [vmem:[%s1474_s28 + $0x20] sm:$0xff]  ;;  %v585_v35 = vld [vmem:[#allocation2 + $0x350] sm:$0xff] }
  0x34   : > { %755 = vmatprep.subr.mxu1 %v520_v45  ;;  %v479_v61 = vld [vmem:[#allocation2] sm:$0xff]  ;;  %v728_v63 = vld [vmem:[#allocation2 + $0x7c8] sm:$0xff]  ;;  %v570_v39 = vld [vmem:[#allocation2 + $0x2d8] sm:$0xff] }
  0x35   : > { %756 = vmatpush1.msra.mxu1 %v519_v46  ;;  %v727_v0 = vld [vmem:[#allocation2 + $0x7c0] sm:$0xff]  ;;  %v720_v1 = vld [vmem:[#allocation2 + $0x788] sm:$0xff]  ;;  %v216_v40 = vld [vmem:[%s1923_s1 + $0x18] sm:$0xff] }
  0x36   : > { %1252 = vmatpush3.xpose.msk.msra.mxu0 %vm273_vm0, %v227_v24  ;;  %757 = vmatprep.subr.mxu1 %v512_v47  ;;  %v719_v3 = vld [vmem:[#allocation2 + $0x780] sm:$0xff]  ;;  %v712_v5 = vld [vmem:[#allocation2 + $0x748] sm:$0xff]  ;;  %v569_v41 = vld [vmem:[#allocation2 + $0x2d0] sm:$0xff] }
  0x37   : > { %1253 = vmatprep.subr.msk.mxu0 %vm273_vm0, %v242_v26  ;;  %758 = vmatpush1.msra.mxu1 %v511_v49  ;;  %v711_v6 = vld [vmem:[#allocation2 + $0x740] sm:$0xff]  ;;  %v704_v7 = vld [vmem:[#allocation2 + $0x708] sm:$0xff]  ;;  %v554_v46 = vld [vmem:[#allocation2 + $0x258] sm:$0xff] }
  0x38   : > { %759 = vmatprep.subr.mxu1 %v504_v51  ;;  %v703_v10 = vld [vmem:[#allocation2 + $0x700] sm:$0xff]  ;;  %v234_v11 = vld [vmem:[%s1474_s28 + $0x88] sm:$0xff]  ;;  %v553_v47 = vld [vmem:[#allocation2 + $0x250] sm:$0xff] }
  0x39   : > { %760 = vmatpush1.msra.mxu1 %v503_v52  ;;  %v696_v12 = vld [vmem:[#allocation2 + $0x6c8] sm:$0xff]  ;;  %v695_v13 = vld [vmem:[#allocation2 + $0x6c0] sm:$0xff]  ;;  %v545_v49 = vld [vmem:[#allocation2 + $0x210] sm:$0xff] }
  0x3a   : > { %1254 = vmatpush3.xpose.msk.msra.mxu0 %vm273_vm0, %v226_v30  ;;  %761 = vmatprep.subr.mxu1 %v496_v53  ;;  %v688_v14 = vld [vmem:[#allocation2 + $0x688] sm:$0xff]  ;;  %v687_v16 = vld [vmem:[#allocation2 + $0x680] sm:$0xff]  ;;  %v537_v51 = vld [vmem:[#allocation2 + $0x1d0] sm:$0xff] }
  0x3b   : > { %1255 = vmatprep.subr.msk.mxu0 %vm273_vm0, %v241_v32  ;;  %762 = vmatpush1.msra.mxu1 %v495_v55  ;;  %v218_v15 = vld [vmem:[%s1474_s28 + $0x8] sm:$0xff]  ;;  %v233_v17 = vld [vmem:[%s1474_s28 + $0x80] sm:$0xff]  ;;  %v530_v52 = vld [vmem:[#allocation2 + $0x198] sm:$0xff] }
  0x3c   : > { %763 = vmatprep.subr.mxu1 %v488_v57  ;;  %v680_v18 = vld [vmem:[#allocation2 + $0x648] sm:$0xff]  ;;  %v679_v19 = vld [vmem:[#allocation2 + $0x640] sm:$0xff]  ;;  %v529_v53 = vld [vmem:[#allocation2 + $0x190] sm:$0xff] }
  0x3d   : > { %764 = vmatpush1.msra.mxu1 %v487_v58  ;;  %v672_v20 = vld [vmem:[#allocation2 + $0x608] sm:$0xff]  ;;  %v217_v21 = vld [vmem:[%s1474_s28] sm:$0xff]  ;;  %v521_v55 = vld [vmem:[#allocation2 + $0x150] sm:$0xff] }
  0x3e   : > { %1256 = vmatpush3.xpose.msk.msra.mxu0 %vm273_vm0, %v225_v36  ;;  %765 = vmatprep.subr.mxu1 %v480_v59  ;;  %v671_v22 = vld [vmem:[#allocation2 + $0x600] sm:$0xff]  ;;  %v664_v24 = vld [vmem:[#allocation2 + $0x5c8] sm:$0xff]  ;;  %v578_v36 = vld [vmem:[#allocation2 + $0x318] sm:$0xff] }
  0x3f   : > { %1257 = vmatprep.subr.msk.mxu0 %vm273_vm0, %v240_v38  ;;  %766 = vmatpush1.msra.mxu1 %v479_v61  ;;  %v663_v25 = vld [vmem:[#allocation2 + $0x5c0] sm:$0xff]  ;;  %v656_v26 = vld [vmem:[#allocation2 + $0x588] sm:$0xff]  ;;  %v513_v57 = vld [vmem:[#allocation2 + $0x110] sm:$0xff] }
  0x40   : > { %767 = vmatprep.subr.mxu1 %v728_v63  ;;  %v214_v27 = vld [vmem:[%s1923_s1 + $0x8] sm:$0xff]  ;;  %v655_v30 = vld [vmem:[#allocation2 + $0x580] sm:$0xff]  ;;  %v506_v58 = vld [vmem:[#allocation2 + $0xd8] sm:$0xff] }
  0x41   : > { %768 = vmatpush2.msra.mxu1 %v727_v0  ;;  %v648_v32 = vld [vmem:[#allocation2 + $0x548] sm:$0xff]  ;;  %v647_v37 = vld [vmem:[#allocation2 + $0x540] sm:$0xff]  ;;  %v505_v59 = vld [vmem:[#allocation2 + $0xd0] sm:$0xff] }
  0x42   : > { %1258 = vmatpush3.xpose.msk.msra.mxu0 %vm273_vm0, %v224_v42  ;;  %769 = vmatprep.subr.mxu1 %v720_v1  ;;  %v640_v38 = vld [vmem:[#allocation2 + $0x508] sm:$0xff]  ;;  %v562_v42 = vld [vmem:[#allocation2 + $0x298] sm:$0xff]  ;;  %v639_v43 = vld [vmem:[#allocation2 + $0x500] sm:$0xff] }
  0x43   : > { %1259 = vmatprep.subr.msk.mxu0 %vm273_vm0, %v239_v44  ;;  %770 = vmatpush2.msra.mxu1 %v719_v3  ;;  %v561_v44 = vld [vmem:[#allocation2 + $0x290] sm:$0xff]  ;;  %v632_v45 = vld [vmem:[#allocation2 + $0x4c8] sm:$0xff]  ;;  %v482_v0 = vld [vmem:[#allocation2 + $0x18] sm:$0xff] }
  0x44   : > { %771 = vmatprep.subr.mxu1 %v712_v5  ;;  %v497_v61 = vld [vmem:[#allocation2 + $0x90] sm:$0xff] }
  0x45   : > { %772 = vmatpush2.msra.mxu1 %v711_v6  ;;  %v489_v63 = vld [vmem:[#allocation2 + $0x50] sm:$0xff]  ;;  %v714_v6 = vld [vmem:[#allocation2 + $0x758] sm:$0xff] }
  0x46   : > { %1260 = vmatpush3.xpose.msk.msra.mxu0 %vm273_vm0, %v223_v48  ;;  %773 = vmatprep.subr.mxu1 %v704_v7  ;;  %v546_v48 = vld [vmem:[#allocation2 + $0x218] sm:$0xff]  ;;  %v481_v1 = vld [vmem:[#allocation2 + $0x10] sm:$0xff] }
  0x47   : > { %1261 = vmatprep.subr.msk.mxu0 %vm273_vm0, %v238_v50  ;;  %774 = vmatpush2.msra.mxu1 %v703_v10  ;;  %v538_v50 = vld [vmem:[#allocation2 + $0x1d8] sm:$0xff]  ;;  %v729_v3 = vld [vmem:[#allocation2 + $0x7d0] sm:$0xff] }
  0x48   : > { %775 = vmatprep.subr.mxu1 %v696_v12  ;;  %v721_v5 = vld [vmem:[#allocation2 + $0x790] sm:$0xff] }
  0x49   : > { %776 = vmatpush2.msra.mxu1 %v695_v13  ;;  %v713_v7 = vld [vmem:[#allocation2 + $0x750] sm:$0xff]  ;;  %v690_v13 = vld [vmem:[#allocation2 + $0x698] sm:$0xff] }
  0x4a   : > { %1262 = vmatpush3.xpose.msk.msra.mxu0 %vm273_vm0, %v222_v54  ;;  %777 = vmatprep.subr.mxu1 %v688_v14  ;;  %v522_v54 = vld [vmem:[#allocation2 + $0x158] sm:$0xff]  ;;  %v705_v10 = vld [vmem:[#allocation2 + $0x710] sm:$0xff] }
  0x4b   : > { %1263 = vmatprep.subr.msk.mxu0 %vm273_vm0, %v237_v56  ;;  %778 = vmatpush2.msra.mxu1 %v687_v16  ;;  %v514_v56 = vld [vmem:[#allocation2 + $0x118] sm:$0xff]  ;;  %v697_v12 = vld [vmem:[#allocation2 + $0x6d0] sm:$0xff] }
  0x4c   : > { %779 = vmatprep.subr.mxu1 %v680_v18  ;;  %v689_v14 = vld [vmem:[#allocation2 + $0x690] sm:$0xff] }
  0x4d   : > { %780 = vmatpush2.msra.mxu1 %v679_v19  ;;  %v681_v16 = vld [vmem:[#allocation2 + $0x650] sm:$0xff]  ;;  %v666_v19 = vld [vmem:[#allocation2 + $0x5d8] sm:$0xff] }
  0x4e   : > { %1264 = vmatpush3.xpose.msk.msra.mxu0 %vm273_vm0, %v221_v60  ;;  %781 = vmatprep.subr.mxu1 %v672_v20  ;;  %v498_v60 = vld [vmem:[#allocation2 + $0x98] sm:$0xff]  ;;  %v673_v18 = vld [vmem:[#allocation2 + $0x610] sm:$0xff] }
  0x4f   : > { %1265 = vmatprep.subr.msk.mxu0 %vm273_vm0, %v236_v62  ;;  %782 = vmatpush2.msra.mxu1 %v671_v22  ;;  %v490_v62 = vld [vmem:[#allocation2 + $0x58] sm:$0xff]  ;;  %v665_v20 = vld [vmem:[#allocation2 + $0x5d0] sm:$0xff] }
  0x50   : > { %783 = vmatprep.subr.mxu1 %v664_v24  ;;  %v657_v22 = vld [vmem:[#allocation2 + $0x590] sm:$0xff] }
  0x51   : > { %784 = vmatpush2.msra.mxu1 %v663_v25  ;;  %v649_v24 = vld [vmem:[#allocation2 + $0x550] sm:$0xff]  ;;  %v642_v25 = vld [vmem:[#allocation2 + $0x518] sm:$0xff] }
  0x52   : > { %1266 = vmatpush3.xpose.msk.msra.mxu0 %vm273_vm0, %v220_v2  ;;  %785 = vmatprep.subr.mxu1 %v656_v26  ;;  %v730_v2 = vld [vmem:[#allocation2 + $0x7d8] sm:$0xff]  ;;  %v641_v26 = vld [vmem:[#allocation2 + $0x510] sm:$0xff] }
  0x53   : > { %1267 = vmatprep.subr.msk.mxu0 %vm273_vm0, %v235_v4  ;;  %786 = vmatpush2.msra.mxu1 %v655_v30  ;;  %v722_v4 = vld [vmem:[#allocation2 + $0x798] sm:$0xff]  ;;  %v624_v30 = vld [vmem:[#allocation2 + $0x488] sm:$0xff] }
  0x54   : > { %787 = vmatprep.subr.mxu1 %v648_v32  ;;  %v623_v32 = vld [vmem:[#allocation2 + $0x480] sm:$0xff] }
  0x55   : > { %788 = vmatpush2.msra.mxu1 %v647_v37  ;;  %v617_v37 = vld [vmem:[#allocation2 + $0x450] sm:$0xff] }
  0x56   : > { %1268 = vmatpush3.xpose.msk.msra.mxu0 %vm273_vm0, %v219_v9  ;;  %789 = vmatprep.subr.mxu1 %v640_v38  ;;  %v706_v9 = vld [vmem:[#allocation2 + $0x718] sm:$0xff] }
  0x57   : > { %1269 = vmatprep.subr.msk.mxu0 %vm273_vm0, %v234_v11  ;;  %790 = vmatpush2.msra.mxu1 %v639_v43  ;;  %v698_v11 = vld [vmem:[#allocation2 + $0x6d8] sm:$0xff] }
  0x58   : > { %791 = vmatprep.subr.mxu1 %v632_v45  ;;  %v610_v38 = vld [vmem:[#allocation2 + $0x418] sm:$0xff] }
  0x5a   : > { %1270 = vmatpush3.xpose.msk.msra.mxu0 %vm273_vm0, %v218_v15  ;;  %v682_v15 = vld [vmem:[#allocation2 + $0x658] sm:$0xff] }
  0x5b   : > { %1271 = vmatprep.subr.msk.mxu0 %vm273_vm0, %v233_v17  ;;  %v674_v17 = vld [vmem:[#allocation2 + $0x618] sm:$0xff] }
  0x5e   : > { %1272 = vmatpush3.xpose.msk.msra.mxu0 %vm273_vm0, %v217_v21  ;;  %v658_v21 = vld [vmem:[#allocation2 + $0x598] sm:$0xff] }
  0x5f   : > { %824 = vmatprep.subr.mxu0 %v602_v23  ;;  %v650_v23 = vld [vmem:[#allocation2 + $0x558] sm:$0xff] }
  0x61   : > { %1274 = vmatmul.mubr.msk.f32.vlgmr.msra.gmra.mxu0 %vm273_vm0, %v1492_v8  ;;  %v577_v8 = vld [vmem:[#allocation2 + $0x310] sm:$0xff] }
  0x62   : > { %1275 = vmatprep.mubr.msk.f32.mxu0 %vm273_vm0, %v214_v27  ;;  %825 = vmatpush1.msra.mxu0 %v601_v28  ;;  %v631_v28 = vld [vmem:[#allocation2 + $0x4c0] sm:$0xff] }
  0x63   : > { %826 = vmatprep.subr.mxu0 %v594_v29  ;;  %v633_v29 = vld [vmem:[#allocation2 + $0x4d0] sm:$0xff]  ;;  %792 = vmatpush2.msra.mxu1 %v631_v28 }
  0x64   : > { %827 = vmatpush1.msra.mxu0 %v593_v31  ;;  %v626_v31 = vld [vmem:[#allocation2 + $0x498] sm:$0xff]  ;;  %793 = vmatprep.subr.mxu1 %v624_v30  ;;  %v1633_v28 = vld [vmem:[#allocation2 + $0x2b0] sm:$0xff]  ;;  %v556_v30 = vld [vmem:[#allocation2 + $0x268] sm:$0xff] }
  0x65   : > { %1276 = vmatmul.mubr.msk.f32.gmra.mxu0 %vm273_vm0, %v214_v27  ;;  %828 = vmatprep.subr.mxu0 %v586_v33  ;;  %v634_v27 = vld [vmem:[#allocation2 + $0x4d8] sm:$0xff]  ;;  %v625_v33 = vld [vmem:[#allocation2 + $0x490] sm:$0xff] }
  0x66   : > { %1277 = vmatprep.mubr.msk.f32.mxu0 %vm273_vm0, %v215_v34  ;;  %829 = vmatpush1.msra.mxu0 %v585_v35  ;;  %v618_v35 = vld [vmem:[#allocation2 + $0x458] sm:$0xff] }
  0x67   : > { %830 = vmatprep.subr.mxu0 %v578_v36  ;;  %794 = vmatpush2.msra.mxu1 %v623_v32  ;;  %v615_v36 = vld [vmem:[#allocation2 + $0x440] sm:$0xff] }
  0x68   : > { %831 = vmatpush1.msra.mxu0 %v577_v8  ;;  %v608_v8 = vld [vmem:[#allocation2 + $0x408] sm:$0xff]  ;;  %v555_v32 = vld [vmem:[#allocation2 + $0x260] sm:$0xff] }
  0x69   : > { %1278 = vmatmul.mubr.msk.f32.gmra.mxu0 %vm273_vm0, %v215_v34  ;;  %832 = vmatprep.subr.mxu0 %v570_v39  ;;  %v616_v34 = vld [vmem:[#allocation2 + $0x448] sm:$0xff]  ;;  %v607_v39 = vld [vmem:[#allocation2 + $0x400] sm:$0xff] }
  0x6a   : > { %1279 = vmatprep.mubr.msk.f32.mxu0 %vm273_vm0, %v216_v40  ;;  %833 = vmatpush1.msra.mxu0 %v569_v41  ;;  %v604_v41 = vld [vmem:[#allocation2 + $0x3e8] sm:$0xff] }
  0x6b   : > { %834 = vmatprep.subr.mxu0 %v562_v42  ;;  %795 = vmatprep.subr.mxu1 %v616_v34  ;;  %v1576_v42 = vld [vmem:[#allocation2 + $0x3f8] sm:$0xff]  ;;  %v548_v34 = vld [vmem:[#allocation2 + $0x228] sm:$0xff] }
  0x6c   : > { %835 = vmatpush1.msra.mxu0 %v561_v44  ;;  %796 = vmatpush2.msra.mxu1 %v615_v36  ;;  %v547_v36 = vld [vmem:[#allocation2 + $0x220] sm:$0xff] }
  0x6d   : > { %1280 = vmatmul.mubr.msk.f32.gmra.mxu0 %vm273_vm0, %v216_v40  ;;  %836 = vmatprep.subr.mxu0 %v554_v46  ;;  %v609_v40 = vld [vmem:[#allocation2 + $0x410] sm:$0xff] }
  0x6e   : > { %837 = vmatpush1.msra.mxu0 %v553_v47  ;;  %797 = vmatprep.subr.mxu1 %v608_v8  ;;  %v540_v8 = vld [vmem:[#allocation2 + $0x1e8] sm:$0xff] }
  0x6f   : > { %838 = vmatprep.subr.mxu0 %v546_v48  ;;  %798 = vmatpush2.msra.mxu1 %v607_v39  ;;  %v539_v39 = vld [vmem:[#allocation2 + $0x1e0] sm:$0xff] }
  0x70   : > { %839 = vmatpush1.msra.mxu0 %v545_v49  ;;  %913 = vmatprep.subr.mxu1 %v604_v41  ;;  %v532_v41 = vld [vmem:[#allocation2 + $0x1a8] sm:$0xff] }
  0x71   : > { %840 = vmatprep.subr.mxu0 %v538_v50 }
  0x72   : > { %841 = vmatpush1.msra.mxu0 %v537_v51 }
  0x73   : > { %842 = vmatprep.subr.mxu0 %v530_v52 }
  0x74   : > { %843 = vmatpush1.msra.mxu0 %v529_v53  ;;  %v603_v53 = vld [vmem:[#allocation2 + $0x3e0] sm:$0xff] }
  0x75   : > { %844 = vmatprep.subr.mxu0 %v522_v54  ;;  %v1583_v54 = vld [vmem:[#allocation2 + $0x3f0] sm:$0xff] }
  0x76   : > { %845 = vmatpush1.msra.mxu0 %v521_v55 }
  0x77   : > { %846 = vmatprep.subr.mxu0 %v514_v56  ;;  %v596_v56 = vld [vmem:[#allocation2 + $0x3a8] sm:$0xff] }
  0x78   : > { %847 = vmatpush1.msra.mxu0 %v513_v57  ;;  %v1587_v57 = vld [vmem:[#allocation2 + $0x3b8] sm:$0xff] }
  0x79   : > { %848 = vmatprep.subr.mxu0 %v506_v58 }
  0x7a   : > { %849 = vmatpush1.msra.mxu0 %v505_v59 }
  0x7b   : > { %850 = vmatprep.subr.mxu0 %v498_v60 }
  0x7c   : > { %851 = vmatpush1.msra.mxu0 %v497_v61  ;;  %v595_v61 = vld [vmem:[#allocation2 + $0x3a0] sm:$0xff] }
  0x7d   : > { %852 = vmatprep.subr.mxu0 %v490_v62  ;;  %v1591_v62 = vld [vmem:[#allocation2 + $0x3b0] sm:$0xff] }
  0x7e   : > { %853 = vmatpush1.msra.mxu0 %v489_v63 }
  0x7f   : > { %854 = vmatprep.subr.mxu0 %v482_v0 }
  0x80   : > { %855 = vmatpush1.msra.mxu0 %v481_v1  ;;  %v588_v1 = vld [vmem:[#allocation2 + $0x368] sm:$0xff] }
  0x81   : > { %856 = vmatprep.subr.mxu0 %v730_v2  ;;  %v1597_v2 = vld [vmem:[#allocation2 + $0x378] sm:$0xff] }
  0x82   : > { %857 = vmatpush2.msra.mxu0 %v729_v3 }
  0x83   : > { %858 = vmatprep.subr.mxu0 %v722_v4 }
  0x84   : > { %859 = vmatpush2.msra.mxu0 %v721_v5 }
  0x85   : > { %860 = vmatprep.subr.mxu0 %v714_v6 }
  0x86   : > { %861 = vmatpush2.msra.mxu0 %v713_v7  ;;  %v587_v7 = vld [vmem:[#allocation2 + $0x360] sm:$0xff] }
  0x87   : > { %862 = vmatprep.subr.mxu0 %v706_v9  ;;  %v1604_v9 = vld [vmem:[#allocation2 + $0x370] sm:$0xff] }
  0x88   : > { %863 = vmatpush2.msra.mxu0 %v705_v10  ;;  %v580_v10 = vld [vmem:[#allocation2 + $0x328] sm:$0xff] }
  0x89   : > { %864 = vmatprep.subr.mxu0 %v698_v11  ;;  %v1607_v11 = vld [vmem:[#allocation2 + $0x338] sm:$0xff] }
  0x8a   : > { %865 = vmatpush2.msra.mxu0 %v697_v12 }
  0x8b   : > { %866 = vmatprep.subr.mxu0 %v690_v13 }
  0x8c   : > { %867 = vmatpush2.msra.mxu0 %v689_v14 }
  0x8d   : > { %868 = vmatprep.subr.mxu0 %v682_v15  ;;  %v579_v15 = vld [vmem:[#allocation2 + $0x320] sm:$0xff] }
  0x8e   : > { %869 = vmatpush2.msra.mxu0 %v681_v16  ;;  %v1613_v16 = vld [vmem:[#allocation2 + $0x330] sm:$0xff] }
  0x8f   : > { %870 = vmatprep.subr.mxu0 %v674_v17 }
  0x90   : > { %871 = vmatpush2.msra.mxu0 %v673_v18 }
  0x91   : > { %872 = vmatprep.subr.mxu0 %v666_v19  ;;  %v572_v19 = vld [vmem:[#allocation2 + $0x2e8] sm:$0xff] }
  0x92   : > { %873 = vmatpush2.msra.mxu0 %v665_v20  ;;  %v1619_v20 = vld [vmem:[#allocation2 + $0x2f8] sm:$0xff] }
  0x93   : > { %874 = vmatprep.subr.mxu0 %v658_v21 }
  0x94   : > { %875 = vmatpush2.msra.mxu0 %v657_v22  ;;  %v571_v22 = vld [vmem:[#allocation2 + $0x2e0] sm:$0xff] }
  0x95   : > { %876 = vmatprep.subr.mxu0 %v650_v23  ;;  %v1624_v23 = vld [vmem:[#allocation2 + $0x2f0] sm:$0xff] }
  0x96   : > { %877 = vmatpush2.msra.mxu0 %v649_v24  ;;  %v564_v24 = vld [vmem:[#allocation2 + $0x2a8] sm:$0xff] }
  0x97   : > { %878 = vmatprep.subr.mxu0 %v642_v25  ;;  %v1627_v25 = vld [vmem:[#allocation2 + $0x2b8] sm:$0xff] }
  0x98   : > { %879 = vmatpush2.msra.mxu0 %v641_v26  ;;  %v256_v43 = vpop.permute.xlu0 %255 }
  0x99   : > { %880 = vmatprep.subr.mxu0 %v634_v27  ;;  %v266_v58 = vpop.permute.xlu1 %265  ;;  %v563_v27 = vld [vmem:[#allocation2 + $0x2a0] sm:$0xff] }
  0x9a   : > { %881 = vmatpush2.msra.mxu0 %v633_v29 }
  0x9b   : > { %882 = vmatprep.subr.mxu0 %v626_v31  ;;  %v1639_v31 = vld [vmem:[#allocation2 + $0x278] sm:$0xff] }
  0x9c   : > { %883 = vmatpush2.msra.mxu0 %v625_v33  ;;  %v261_v51 = vpop.permute.xlu0 %260  ;;  %v1644_v33 = vld [vmem:[#allocation2 + $0x270] sm:$0xff] }
  0x9d   : > { %884 = vmatprep.subr.mxu0 %v618_v35  ;;  %v271_v12 = vpop.permute.xlu1 %270  ;;  %v1649_v35 = vld [vmem:[#allocation2 + $0x238] sm:$0xff] }
  0x9e   : > { %885 = vmatpush2.msra.mxu0 %v617_v37  ;;  %v1652_v37 = vld [vmem:[#allocation2 + $0x230] sm:$0xff] }
  0x9f   : > { %886 = vmatprep.subr.mxu0 %v610_v38  ;;  %v1655_v38 = vld [vmem:[#allocation2 + $0x1f8] sm:$0xff] }
  0xa0   : > { %887 = vmatpush2.msra.mxu0 %v609_v40  ;;  %v1659_v40 = vld [vmem:[#allocation2 + $0x1f0] sm:$0xff] }
  0xa1   : > { %1002 = vmatprep.subr.mxu0 %v1576_v42 }
 0x121   : > { %v448_v44 = vpop.f32.mrf.mxu0 }
 0x122   : > { %v449_v45 = vadd.f32 %v448_v44, %v256_v43  ;;  %v531_v44 = vld [vmem:[#allocation2 + $0x1a0] sm:$0xff] }
 0x123   : > { %v450_v46 = vpop.f32.mrf.mxu0 }
 0x124   : > { %v451_v47 = vadd.f32 %v450_v46, %v256_v43  ;;  %v1581_v50 = vmax.f32 %v449_v45, 0.0  ;;  %v1662_v43 = vld [vmem:[#allocation2 + $0x1b8] sm:$0xff]  ;;  %v1665_v45 = vld [vmem:[#allocation2 + $0x1b0] sm:$0xff]  ;;  %v524_v46 = vld [vmem:[#allocation2 + $0x168] sm:$0xff] }
 0x125   : > { %v454_v48 = vpop.f32.mrf.mxu0 }
 0x126   : > { %v1579_v49 = vmax.f32 %v451_v47, 0.0  ;;  %v455_v59 = vadd.f32 %v454_v48, %v261_v51  ;;  %v1668_v47 = vld [vmem:[#allocation2 + $0x178] sm:$0xff]  ;;  %v523_v48 = vld [vmem:[#allocation2 + $0x160] sm:$0xff] }
 0x127   : > { %v456_v52 = vpop.f32.mrf.mxu0 }
 0x128   : > { %v457_v55 = vadd.f32 %v456_v52, %v261_v51  ;;  %799 = vmatprep.mubr.f32.mxu1 %v1579_v49  ;;  %888 = vmatprep.mubr.f32.mxu0 %v1579_v49  ;;  %v1600_v4 = vmax.f32 %v455_v59, 0.0  ;;  %v516_v51 = vld [vmem:[#allocation2 + $0x128] sm:$0xff]  ;;  %v1674_v52 = vld [vmem:[#allocation2 + $0x138] sm:$0xff]  ;;  %v507_v59 = vld [vmem:[#allocation2 + $0xe0] sm:$0xff] }
 0x129   : > { %v460_v60 = vpop.f32.mrf.mxu0  ;;  %800 = vmatmul.mubr.f32.vlgmr.msra.gmra.mxu1 %v1581_v50  ;;  %889 = vmatmul.mubr.f32.vlgmr.msra.gmra.mxu0 %v1581_v50 }
 0x12a   : > { %v1593_v63 = vmax.f32 %v457_v55, 0.0  ;;  %914 = vmatpush1.msra.mxu1 %v603_v53  ;;  %1003 = vmatpush1.msra.mxu0 %v1583_v54  ;;  %v461_v5 = vadd.f32 %v460_v60, %v266_v58  ;;  %v515_v53 = vld [vmem:[#allocation2 + $0x120] sm:$0xff]  ;;  %v1677_v55 = vld [vmem:[#allocation2 + $0x130] sm:$0xff] }
 0x12b   : > { %915 = vmatprep.subr.mxu1 %v596_v56  ;;  %1004 = vmatprep.subr.mxu0 %v1587_v57  ;;  %v462_v0 = vpop.f32.mrf.mxu0  ;;  %v508_v56 = vld [vmem:[#allocation2 + $0xe8] sm:$0xff]  ;;  %v1683_v60 = vld [vmem:[#allocation2 + $0xf0] sm:$0xff] }
 0x12c   : > { %v463_v3 = vadd.f32 %v462_v0, %v266_v58  ;;  %916 = vmatpush1.msra.mxu1 %v595_v61  ;;  %1005 = vmatpush1.msra.mxu0 %v1591_v62  ;;  %v1616_v17 = vmax.f32 %v461_v5, 0.0  ;;  %v1680_v58 = vld [vmem:[#allocation2 + $0xf8] sm:$0xff]  ;;  %v500_v61 = vld [vmem:[#allocation2 + $0xa8] sm:$0xff] }
 0x12d   : > { %805 = vmatprep.mubr.f32.mxu1 %v1593_v63  ;;  %894 = vmatprep.mubr.f32.mxu0 %v1593_v63  ;;  %v466_v6 = vpop.f32.mrf.mxu0  ;;  %v1686_v0 = vld [vmem:[#allocation2 + $0xb8] sm:$0xff]  ;;  %v492_v5 = vld [vmem:[#allocation2 + $0x68] sm:$0xff] }
 0x12e   : > { %917 = vmatprep.subr.mxu1 %v588_v1  ;;  %1006 = vmatprep.subr.mxu0 %v1597_v2  ;;  %v1609_v13 = vmax.f32 %v463_v3, 0.0  ;;  %v467_v21 = vadd.f32 %v466_v6, %v271_v12  ;;  %v499_v1 = vld [vmem:[#allocation2 + $0xa0] sm:$0xff]  ;;  %v1689_v3 = vld [vmem:[#allocation2 + $0xb0] sm:$0xff]  ;;  %v1692_v6 = vld [vmem:[#allocation2 + $0x78] sm:$0xff] }
 0x12f   : > { %806 = vmatmul.mubr.f32.gmra.mxu1 %v1600_v4  ;;  %895 = vmatmul.mubr.f32.gmra.mxu0 %v1600_v4  ;;  %v468_v14 = vpop.f32.mrf.mxu0 }
 0x130   : > { %918 = vmatpush1.msra.mxu1 %v587_v7  ;;  %1007 = vmatpush1.msra.mxu0 %v1604_v9  ;;  %v469_v18 = vadd.f32 %v468_v14, %v271_v12  ;;  %v1636_v29 = vmax.f32 %v467_v21, 0.0  ;;  %v491_v7 = vld [vmem:[#allocation2 + $0x60] sm:$0xff]  ;;  %v484_v12 = vld [vmem:[#allocation2 + $0x28] sm:$0xff]  ;;  %v1698_v14 = vld [vmem:[#allocation2 + $0x38] sm:$0xff] }
 0x131   : > { %919 = vmatprep.subr.mxu1 %v580_v10  ;;  %1008 = vmatprep.subr.mxu0 %v1607_v11  ;;  %v1695_v10 = vld [vmem:[#allocation2 + $0x70] sm:$0xff]  ;;  %v1704_v21 = vld [vmem:[#allocation2 + $0x7f8] sm:$0xff] }
 0x132   : > { %920 = vmatpush1.msra.mxu1 %v579_v15  ;;  %1009 = vmatpush1.msra.mxu0 %v1613_v16  ;;  %v1629_v26 = vmax.f32 %v469_v18, 0.0  ;;  %v483_v15 = vld [vmem:[#allocation2 + $0x20] sm:$0xff]  ;;  %v1701_v18 = vld [vmem:[#allocation2 + $0x30] sm:$0xff] }
 0x133   : > { %811 = vmatprep.mubr.f32.mxu1 %v1609_v13  ;;  %900 = vmatprep.mubr.f32.mxu0 %v1609_v13 }
 0x134   : > { %921 = vmatprep.subr.mxu1 %v572_v19  ;;  %1010 = vmatprep.subr.mxu0 %v1619_v20  ;;  %v732_v19 = vld [vmem:[#allocation2 + $0x7e8] sm:$0xff] }
 0x135   : > { %812 = vmatmul.mubr.f32.gmra.mxu1 %v1616_v17  ;;  %901 = vmatmul.mubr.f32.gmra.mxu0 %v1616_v17 }
 0x136   : > { %922 = vmatpush1.msra.mxu1 %v571_v22  ;;  %1011 = vmatpush1.msra.mxu0 %v1624_v23  ;;  %v731_v22 = vld [vmem:[#allocation2 + $0x7e0] sm:$0xff] }
 0x137   : > { %923 = vmatprep.subr.mxu1 %v564_v24  ;;  %1012 = vmatprep.subr.mxu0 %v1627_v25  ;;  %v1707_v24 = vld [vmem:[#allocation2 + $0x7f0] sm:$0xff] }
 0x138   : > { %924 = vmatpush1.msra.mxu1 %v563_v27  ;;  %1013 = vmatpush1.msra.mxu0 %v1633_v28  ;;  %v724_v27 = vld [vmem:[#allocation2 + $0x7a8] sm:$0xff] }
 0x139   : > { %817 = vmatprep.mubr.f32.mxu1 %v1629_v26  ;;  %906 = vmatprep.mubr.f32.mxu0 %v1629_v26 }
 0x13a   : > { %925 = vmatprep.subr.mxu1 %v556_v30  ;;  %1014 = vmatprep.subr.mxu0 %v1639_v31  ;;  %v1710_v30 = vld [vmem:[#allocation2 + $0x7b8] sm:$0xff] }
 0x13b   : > { %818 = vmatmul.mubr.f32.gmra.mxu1 %v1636_v29  ;;  %907 = vmatmul.mubr.f32.gmra.mxu0 %v1636_v29 }
 0x13c   : > { %926 = vmatpush1.msra.mxu1 %v555_v32  ;;  %1015 = vmatpush1.msra.mxu0 %v1644_v33  ;;  %v723_v32 = vld [vmem:[#allocation2 + $0x7a0] sm:$0xff] }
 0x13d   : > { %927 = vmatprep.subr.mxu1 %v548_v34  ;;  %977 = vmatprep.mubr.f32.mxu1 %v1579_v49  ;;  %v1713_v34 = vld [vmem:[#allocation2 + $0x7b0] sm:$0xff] }
 0x13e   : > { %1016 = vmatprep.subr.mxu0 %v1649_v35  ;;  %1066 = vmatprep.mubr.f32.mxu0 %v1579_v49  ;;  %v1671_v49 = vld [vmem:[#allocation2 + $0x170] sm:$0xff] }
 0x13f   : > { %928 = vmatpush1.msra.mxu1 %v547_v36  ;;  %1017 = vmatpush1.msra.mxu0 %v1652_v37  ;;  %v716_v36 = vld [vmem:[#allocation2 + $0x768] sm:$0xff] }
 0x140   : > { %929 = vmatprep.subr.mxu1 %v540_v8  ;;  %1018 = vmatprep.subr.mxu0 %v1655_v38  ;;  %v1716_v8 = vld [vmem:[#allocation2 + $0x778] sm:$0xff] }
 0x141   : > { %930 = vmatpush1.msra.mxu1 %v539_v39  ;;  %1019 = vmatpush1.msra.mxu0 %v1659_v40  ;;  %v715_v39 = vld [vmem:[#allocation2 + $0x760] sm:$0xff] }
 0x142   : > { %931 = vmatprep.subr.mxu1 %v532_v41  ;;  %1020 = vmatprep.subr.mxu0 %v1662_v43  ;;  %v1719_v41 = vld [vmem:[#allocation2 + $0x770] sm:$0xff] }
 0x143   : > { %932 = vmatpush1.msra.mxu1 %v531_v44  ;;  %1021 = vmatpush1.msra.mxu0 %v1665_v45  ;;  %v708_v44 = vld [vmem:[#allocation2 + $0x728] sm:$0xff] }
 0x144   : > { %933 = vmatprep.subr.mxu1 %v524_v46  ;;  %1022 = vmatprep.subr.mxu0 %v1668_v47  ;;  %v1722_v46 = vld [vmem:[#allocation2 + $0x738] sm:$0xff] }
 0x145   : > { %934 = vmatpush1.msra.mxu1 %v523_v48  ;;  %1023 = vmatpush1.msra.mxu0 %v1671_v49  ;;  %v707_v48 = vld [vmem:[#allocation2 + $0x720] sm:$0xff] }
 0x146   : > { %935 = vmatprep.subr.mxu1 %v516_v51  ;;  %1024 = vmatprep.subr.mxu0 %v1674_v52  ;;  %v1725_v51 = vld [vmem:[#allocation2 + $0x730] sm:$0xff] }
 0x147   : > { %936 = vmatpush1.msra.mxu1 %v515_v53  ;;  %1025 = vmatpush1.msra.mxu0 %v1677_v55  ;;  %v700_v53 = vld [vmem:[#allocation2 + $0x6e8] sm:$0xff] }
 0x148   : > { %937 = vmatprep.subr.mxu1 %v508_v56  ;;  %1026 = vmatprep.subr.mxu0 %v1680_v58  ;;  %v1728_v56 = vld [vmem:[#allocation2 + $0x6f8] sm:$0xff] }
 0x149   : > { %938 = vmatpush1.msra.mxu1 %v507_v59  ;;  %1027 = vmatpush1.msra.mxu0 %v1683_v60  ;;  %v699_v59 = vld [vmem:[#allocation2 + $0x6e0] sm:$0xff] }
 0x14a   : > { %939 = vmatprep.subr.mxu1 %v500_v61  ;;  %1028 = vmatprep.subr.mxu0 %v1686_v0  ;;  %v1731_v61 = vld [vmem:[#allocation2 + $0x6f0] sm:$0xff] }
 0x14b   : > { %940 = vmatpush1.msra.mxu1 %v499_v1  ;;  %1029 = vmatpush1.msra.mxu0 %v1689_v3  ;;  %v692_v1 = vld [vmem:[#allocation2 + $0x6a8] sm:$0xff] }
 0x14c   : > { %941 = vmatprep.subr.mxu1 %v492_v5  ;;  %1030 = vmatprep.subr.mxu0 %v1692_v6  ;;  %v1734_v5 = vld [vmem:[#allocation2 + $0x6b8] sm:$0xff] }
 0x14d   : > { %942 = vmatpush1.msra.mxu1 %v491_v7  ;;  %1031 = vmatpush1.msra.mxu0 %v1695_v10  ;;  %v691_v7 = vld [vmem:[#allocation2 + $0x6a0] sm:$0xff] }
 0x14e   : > { %943 = vmatprep.subr.mxu1 %v484_v12  ;;  %1032 = vmatprep.subr.mxu0 %v1698_v14  ;;  %v1737_v12 = vld [vmem:[#allocation2 + $0x6b0] sm:$0xff] }
 0x14f   : > { %944 = vmatpush1.msra.mxu1 %v483_v15  ;;  %1033 = vmatpush1.msra.mxu0 %v1701_v18  ;;  %v684_v15 = vld [vmem:[#allocation2 + $0x668] sm:$0xff] }
 0x150   : > { %945 = vmatprep.subr.mxu1 %v732_v19  ;;  %1034 = vmatprep.subr.mxu0 %v1704_v21  ;;  %v1740_v19 = vld [vmem:[#allocation2 + $0x678] sm:$0xff] }
 0x151   : > { %946 = vmatpush2.msra.mxu1 %v731_v22  ;;  %1035 = vmatpush2.msra.mxu0 %v1707_v24  ;;  %v683_v22 = vld [vmem:[#allocation2 + $0x660] sm:$0xff] }
 0x152   : > { %947 = vmatprep.subr.mxu1 %v724_v27  ;;  %1036 = vmatprep.subr.mxu0 %v1710_v30  ;;  %v1743_v27 = vld [vmem:[#allocation2 + $0x670] sm:$0xff] }
 0x153   : > { %948 = vmatpush2.msra.mxu1 %v723_v32  ;;  %1037 = vmatpush2.msra.mxu0 %v1713_v34  ;;  %1941 = vst [vmem:[#allocation5_spill] sm:$0xff] %v1743_v27  ;;  %v676_v32 = vld [vmem:[#allocation2 + $0x628] sm:$0xff] }
 0x154   : > { %949 = vmatprep.subr.mxu1 %v716_v36  ;;  %1038 = vmatprep.subr.mxu0 %v1716_v8  ;;  %v1746_v36 = vld [vmem:[#allocation2 + $0x638] sm:$0xff] }
 0x155   : > { %950 = vmatpush2.msra.mxu1 %v715_v39  ;;  %1039 = vmatpush2.msra.mxu0 %v1719_v41  ;;  %1942 = vst [vmem:[#allocation6_spill] sm:$0xff] %v1746_v36  ;;  %v675_v39 = vld [vmem:[#allocation2 + $0x620] sm:$0xff] }
 0x156   : > { %951 = vmatprep.subr.mxu1 %v708_v44  ;;  %1040 = vmatprep.subr.mxu0 %v1722_v46  ;;  %v1749_v44 = vld [vmem:[#allocation2 + $0x630] sm:$0xff] }
 0x157   : > { %952 = vmatpush2.msra.mxu1 %v707_v48  ;;  %1041 = vmatpush2.msra.mxu0 %v1725_v51  ;;  %1943 = vst [vmem:[#allocation7_spill] sm:$0xff] %v1749_v44  ;;  %v668_v48 = vld [vmem:[#allocation2 + $0x5e8] sm:$0xff] }
 0x158   : > { %953 = vmatprep.subr.mxu1 %v700_v53  ;;  %1042 = vmatprep.subr.mxu0 %v1728_v56  ;;  %v1752_v53 = vld [vmem:[#allocation2 + $0x5f8] sm:$0xff] }
 0x159   : > { %954 = vmatpush2.msra.mxu1 %v699_v59  ;;  %1043 = vmatpush2.msra.mxu0 %v1731_v61  ;;  %1944 = vst [vmem:[#allocation8_spill] sm:$0xff] %v1752_v53  ;;  %v667_v59 = vld [vmem:[#allocation2 + $0x5e0] sm:$0xff] }
 0x15a   : > { %955 = vmatprep.subr.mxu1 %v692_v1  ;;  %1044 = vmatprep.subr.mxu0 %v1734_v5  ;;  %v1755_v1 = vld [vmem:[#allocation2 + $0x5f0] sm:$0xff] }
 0x15b   : > { %956 = vmatpush2.msra.mxu1 %v691_v7  ;;  %1045 = vmatpush2.msra.mxu0 %v1737_v12  ;;  %1945 = vst [vmem:[#allocation9_spill] sm:$0xff] %v1755_v1  ;;  %v660_v7 = vld [vmem:[#allocation2 + $0x5a8] sm:$0xff] }
 0x15c   : > { %957 = vmatprep.subr.mxu1 %v684_v15  ;;  %1046 = vmatprep.subr.mxu0 %v1740_v19  ;;  %v1758_v15 = vld [vmem:[#allocation2 + $0x5b8] sm:$0xff] }
 0x15d   : > { %958 = vmatpush2.msra.mxu1 %v683_v22  ;;  %1047 = vmatpush2.msra.mxu0 %v1743_v27  ;;  %1946 = vst [vmem:[#allocation10_spill] sm:$0xff] %v1758_v15  ;;  %v659_v22 = vld [vmem:[#allocation2 + $0x5a0] sm:$0xff]  ;;  %v1761_v27 = vld [vmem:[#allocation2 + $0x5b0] sm:$0xff] }
 0x15e   : > { %959 = vmatprep.subr.mxu1 %v676_v32  ;;  %1048 = vmatprep.subr.mxu0 %v1746_v36  ;;  %1947 = vst [vmem:[#allocation11_spill] sm:$0xff] %v1761_v27  ;;  %v652_v32 = vld [vmem:[#allocation2 + $0x568] sm:$0xff]  ;;  %v1764_v36 = vld [vmem:[#allocation2 + $0x578] sm:$0xff] }
 0x15f   : > { %960 = vmatpush2.msra.mxu1 %v675_v39  ;;  %1049 = vmatpush2.msra.mxu0 %v1749_v44  ;;  %1948 = vst [vmem:[#allocation12_spill] sm:$0xff] %v1764_v36  ;;  %v651_v39 = vld [vmem:[#allocation2 + $0x560] sm:$0xff]  ;;  %v1767_v44 = vld [vmem:[#allocation2 + $0x570] sm:$0xff] }
 0x160   : > { %961 = vmatprep.subr.mxu1 %v668_v48  ;;  %1050 = vmatprep.subr.mxu0 %v1752_v53  ;;  %1949 = vst [vmem:[#allocation13_spill] sm:$0xff] %v1767_v44  ;;  %v644_v48 = vld [vmem:[#allocation2 + $0x528] sm:$0xff]  ;;  %v1770_v53 = vld [vmem:[#allocation2 + $0x538] sm:$0xff] }
 0x161   : > { %962 = vmatpush2.msra.mxu1 %v667_v59  ;;  %1051 = vmatpush2.msra.mxu0 %v1755_v1  ;;  %1950 = vst [vmem:[#allocation14_spill] sm:$0xff] %v1770_v53  ;;  %v643_v59 = vld [vmem:[#allocation2 + $0x520] sm:$0xff]  ;;  %v1773_v1 = vld [vmem:[#allocation2 + $0x530] sm:$0xff] }
 0x162   : > { %963 = vmatprep.subr.mxu1 %v660_v7  ;;  %1052 = vmatprep.subr.mxu0 %v1758_v15  ;;  %1951 = vst [vmem:[#allocation15_spill] sm:$0xff] %v1773_v1  ;;  %v636_v7 = vld [vmem:[#allocation2 + $0x4e8] sm:$0xff]  ;;  %v1776_v15 = vld [vmem:[#allocation2 + $0x4f8] sm:$0xff] }
 0x163   : > { %964 = vmatpush2.msra.mxu1 %v659_v22  ;;  %1053 = vmatpush2.msra.mxu0 %v1761_v27  ;;  %1952 = vst [vmem:[#allocation16_spill] sm:$0xff] %v1776_v15  ;;  %v635_v22 = vld [vmem:[#allocation2 + $0x4e0] sm:$0xff]  ;;  %v1779_v27 = vld [vmem:[#allocation2 + $0x4f0] sm:$0xff] }
 0x164   : > { %965 = vmatprep.subr.mxu1 %v652_v32  ;;  %1054 = vmatprep.subr.mxu0 %v1764_v36  ;;  %1953 = vst [vmem:[#allocation17_spill] sm:$0xff] %v1779_v27  ;;  %v628_v32 = vld [vmem:[#allocation2 + $0x4a8] sm:$0xff]  ;;  %v1782_v36 = vld [vmem:[#allocation2 + $0x4b8] sm:$0xff] }
 0x165   : > { %966 = vmatpush2.msra.mxu1 %v651_v39  ;;  %1055 = vmatpush2.msra.mxu0 %v1767_v44  ;;  %v627_v39 = vld [vmem:[#allocation2 + $0x4a0] sm:$0xff]  ;;  %v1785_v44 = vld [vmem:[#allocation2 + $0x4b0] sm:$0xff] }
 0x166   : > { %967 = vmatprep.subr.mxu1 %v644_v48  ;;  %1056 = vmatprep.subr.mxu0 %v1770_v53  ;;  %v620_v48 = vld [vmem:[#allocation2 + $0x468] sm:$0xff]  ;;  %v1788_v53 = vld [vmem:[#allocation2 + $0x478] sm:$0xff] }
 0x167   : > { %968 = vmatpush2.msra.mxu1 %v643_v59  ;;  %1057 = vmatpush2.msra.mxu0 %v1773_v1  ;;  %v619_v59 = vld [vmem:[#allocation2 + $0x460] sm:$0xff]  ;;  %v1791_v1 = vld [vmem:[#allocation2 + $0x470] sm:$0xff] }
 0x168   : > { %969 = vmatprep.subr.mxu1 %v636_v7  ;;  %1058 = vmatprep.subr.mxu0 %v1776_v15  ;;  %v612_v7 = vld [vmem:[#allocation2 + $0x428] sm:$0xff]  ;;  %v1794_v15 = vld [vmem:[#allocation2 + $0x438] sm:$0xff] }
 0x169   : > { %970 = vmatpush2.msra.mxu1 %v635_v22  ;;  %1059 = vmatpush2.msra.mxu0 %v1779_v27  ;;  %v611_v22 = vld [vmem:[#allocation2 + $0x420] sm:$0xff]  ;;  %v1797_v27 = vld [vmem:[#allocation2 + $0x430] sm:$0xff] }
 0x16a   : > { %971 = vmatprep.subr.mxu1 %v628_v32  ;;  %1060 = vmatprep.subr.mxu0 %v1782_v36 }
 0x16b   : > { %972 = vmatpush2.msra.mxu1 %v627_v39  ;;  %1061 = vmatpush2.msra.mxu0 %v1785_v44 }
 0x16c   : > { %973 = vmatprep.subr.mxu1 %v620_v48  ;;  %1062 = vmatprep.subr.mxu0 %v1788_v53 }
 0x16d   : > { %974 = vmatpush2.msra.mxu1 %v619_v59  ;;  %1063 = vmatpush2.msra.mxu0 %v1791_v1 }
 0x16e   : > { %975 = vmatprep.subr.mxu1 %v612_v7  ;;  %1064 = vmatprep.subr.mxu0 %v1794_v15 }
 0x16f   : > { %976 = vmatpush2.msra.mxu1 %v611_v22  ;;  %1065 = vmatpush2.msra.mxu0 %v1797_v27 }
 0x170   : > { %978 = vmatmul.mubr.f32.vlgmr.msra.gmra.mxu1 %v1581_v50  ;;  %1281 = vmatprep.subr.mxu1 %v1576_v42  ;;  %v1954_v42 = vld [vmem:[#allocation5_spill] sm:$0xff] }
 0x171   : > { %1067 = vmatmul.mubr.f32.vlgmr.msra.gmra.mxu0 %v1581_v50  ;;  %983 = vmatprep.mubr.f32.mxu1 %v1593_v63  ;;  %v1955_v50 = vld [vmem:[#allocation6_spill] sm:$0xff] }
 0x172   : > { %1313 = vmatpush1.msra.mxu1 %v1583_v54  ;;  %1072 = vmatprep.mubr.f32.mxu0 %v1593_v63  ;;  %v1956_v54 = vld [vmem:[#allocation7_spill] sm:$0xff]  ;;  %v1959_v63 = vld [vmem:[#allocation10_spill] sm:$0xff] }
 0x173   : > { %1282 = vmatprep.subr.mxu1 %v1587_v57  ;;  %v1957_v57 = vld [vmem:[#allocation8_spill] sm:$0xff] }
 0x174   : > { %1314 = vmatpush1.msra.mxu1 %v1591_v62  ;;  %v1958_v62 = vld [vmem:[#allocation9_spill] sm:$0xff] }
 0x175   : > { %984 = vmatmul.mubr.f32.gmra.mxu1 %v1600_v4  ;;  %1283 = vmatprep.subr.mxu1 %v1597_v2  ;;  %v1960_v2 = vld [vmem:[#allocation11_spill] sm:$0xff] }
 0x176   : > { %1073 = vmatmul.mubr.f32.gmra.mxu0 %v1600_v4  ;;  %989 = vmatprep.mubr.f32.mxu1 %v1609_v13  ;;  %v1961_v4 = vld [vmem:[#allocation12_spill] sm:$0xff] }
 0x177   : > { %1315 = vmatpush1.msra.mxu1 %v1604_v9  ;;  %v1962_v9 = vld [vmem:[#allocation13_spill] sm:$0xff] }
 0x178   : > { %1284 = vmatprep.subr.mxu1 %v1607_v11  ;;  %v1963_v11 = vld [vmem:[#allocation14_spill] sm:$0xff] }
 0x179   : > { %1316 = vmatpush1.msra.mxu1 %v1613_v16  ;;  %v1965_v16 = vld [vmem:[#allocation16_spill] sm:$0xff] }
 0x17a   : > { %990 = vmatmul.mubr.f32.gmra.mxu1 %v1616_v17  ;;  %1285 = vmatprep.subr.mxu1 %v1619_v20  ;;  %v1966_v20 = vld [vmem:[#allocation17_spill] sm:$0xff] }
 0x17b   : > { %995 = vmatprep.mubr.f32.mxu1 %v1629_v26  ;;  %1317 = vmatpush1.msra.mxu1 %v1624_v23 }
 0x17c   : > { %1286 = vmatprep.subr.mxu1 %v1627_v25 }
 0x17d   : > { %1318 = vmatpush1.msra.mxu1 %v1633_v28 }
 0x17e   : > { %996 = vmatmul.mubr.f32.gmra.mxu1 %v1636_v29  ;;  %1287 = vmatprep.subr.mxu1 %v1639_v31 }
 0x17f   : > { %1319 = vmatpush1.msra.mxu1 %v1644_v33  ;;  %1078 = vmatprep.mubr.f32.mxu1 %v1609_v13  ;;  %v1964_v13 = vld [vmem:[#allocation15_spill] sm:$0xff] }
 0x180   : > { %1288 = vmatprep.subr.mxu1 %v1649_v35 }
 0x181   : > { %1320 = vmatpush1.msra.mxu1 %v1652_v37 }
 0x182   : > { %1289 = vmatprep.subr.mxu1 %v1655_v38 }
 0x183   : > { %1321 = vmatpush1.msra.mxu1 %v1659_v40 }
 0x184   : > { %1290 = vmatprep.subr.mxu1 %v1662_v43 }
 0x185   : > { %1322 = vmatpush1.msra.mxu1 %v1665_v45 }
 0x186   : > { %1291 = vmatprep.subr.mxu1 %v1668_v47 }
 0x187   : > { %1323 = vmatpush1.msra.mxu1 %v1671_v49 }
 0x188   : > { %1292 = vmatprep.subr.mxu1 %v1674_v52 }
 0x189   : > { %1324 = vmatpush1.msra.mxu1 %v1677_v55 }
 0x18a   : > { %1293 = vmatprep.subr.mxu1 %v1680_v58 }
 0x18b   : > { %1325 = vmatpush1.msra.mxu1 %v1683_v60 }
 0x18c   : > { %1294 = vmatprep.subr.mxu1 %v1686_v0 }
 0x18d   : > { %1326 = vmatpush1.msra.mxu1 %v1689_v3 }
 0x18e   : > { %1295 = vmatprep.subr.mxu1 %v1692_v6 }
 0x18f   : > { %1327 = vmatpush1.msra.mxu1 %v1695_v10 }
 0x190   : > { %1296 = vmatprep.subr.mxu1 %v1698_v14 }
 0x191   : > { %1328 = vmatpush1.msra.mxu1 %v1701_v18 }
 0x192   : > { %1297 = vmatprep.subr.mxu1 %v1704_v21 }
 0x193   : > { %1329 = vmatpush2.msra.mxu1 %v1707_v24 }
 0x194   : > { %1298 = vmatprep.subr.mxu1 %v1710_v30 }
 0x195   : > { %1330 = vmatpush2.msra.mxu1 %v1713_v34 }
 0x196   : > { %1299 = vmatprep.subr.mxu1 %v1716_v8 }
 0x197   : > { %1331 = vmatpush2.msra.mxu1 %v1719_v41 }
 0x198   : > { %1300 = vmatprep.subr.mxu1 %v1722_v46 }
 0x199   : > { %1332 = vmatpush2.msra.mxu1 %v1725_v51 }
 0x19a   : > { %1301 = vmatprep.subr.mxu1 %v1728_v56 }
 0x19b   : > { %1333 = vmatpush2.msra.mxu1 %v1731_v61 }
 0x19c   : > { %1302 = vmatprep.subr.mxu1 %v1734_v5 }
 0x19d   : > { %1334 = vmatpush2.msra.mxu1 %v1737_v12 }
 0x19e   : > { %1303 = vmatprep.subr.mxu1 %v1740_v19 }
 0x19f   : > { %1335 = vmatpush2.msra.mxu1 %v1954_v42 }
 0x1a0   : > { %1304 = vmatprep.subr.mxu1 %v1955_v50 }
 0x1a1   : > { %1336 = vmatpush2.msra.mxu1 %v1956_v54 }
 0x1a2   : > { %1305 = vmatprep.subr.mxu1 %v1957_v57 }
 0x1a3   : > { %1337 = vmatpush2.msra.mxu1 %v1958_v62 }
 0x1a4   : > { %1306 = vmatprep.subr.mxu1 %v1959_v63 }
 0x1a5   : > { %1338 = vmatpush2.msra.mxu1 %v1960_v2 }
 0x1a6   : > { %1307 = vmatprep.subr.mxu1 %v1961_v4 }
 0x1a7   : > { %1339 = vmatpush2.msra.mxu1 %v1962_v9 }
 0x1a8   : > { %1308 = vmatprep.subr.mxu1 %v1963_v11 }
 0x1a9   : > { %1340 = vmatpush2.msra.mxu1 %v1964_v13 }
 0x1aa   : > { %1309 = vmatprep.subr.mxu1 %v1965_v16 }
 0x1ab   : > { %1341 = vmatpush2.msra.mxu1 %v1966_v20 }
 0x1ac   : > { %1310 = vmatprep.subr.mxu1 %v1782_v36 }
 0x1ad   : > { %1342 = vmatpush2.msra.mxu1 %v1785_v44 }
 0x1ae   : > { %1311 = vmatprep.subr.mxu1 %v1788_v53 }
 0x1af   : > { %1343 = vmatpush2.msra.mxu1 %v1791_v1 }
 0x1b0   : > { %1312 = vmatprep.subr.mxu1 %v1794_v15 }
 0x1b1   : > { %1344 = vmatpush2.msra.mxu1 %v1797_v27 }
 0x1b2   : > { %1079 = vmatmul.mubr.f32.vlgmr.msra.gmra.mxu1 %v1616_v17 }
 0x1b3   : > { %1084 = vmatprep.mubr.f32.mxu1 %v1629_v26 }
 0x1b6   : > { %1085 = vmatmul.mubr.f32.gmra.mxu1 %v1636_v29 }
 0x1e9   : > { %v801_v23 = vpop.f32.mrf.mxu1  ;;  %v890_v17 = vpop.f32.mrf.mxu0 }
 0x1ea   : > { %1091 = vst [vmem:[%s1885_s23] sm:$0xff] %v801_v23  ;;  %1093 = vst [vmem:[%s1885_s23 + $0x10] sm:$0xff] %v890_v17 }
 0x1eb   : > { %v803_v25 = vpop.f32.mrf.mxu1  ;;  %v892_v26 = vpop.f32.mrf.mxu0 }
 0x1ec   : > { %1092 = vst [vmem:[%s1885_s23 + $0x8] sm:$0xff] %v803_v25  ;;  %1094 = vst [vmem:[%s1885_s23 + $0x18] sm:$0xff] %v892_v26 }
 0x1ef   : > { %v807_v28 = vpop.f32.mrf.mxu1  ;;  %v896_v29 = vpop.f32.mrf.mxu0 }
 0x1f0   : > { %1099 = vst [vmem:[%s1885_s23 + $0x40] sm:$0xff] %v807_v28  ;;  %1101 = vst [vmem:[%s1885_s23 + $0x50] sm:$0xff] %v896_v29 }
 0x1f1   : > { %v809_v31 = vpop.f32.mrf.mxu1  ;;  %v898_v33 = vpop.f32.mrf.mxu0 }
 0x1f2   : > { %1100 = vst [vmem:[%s1885_s23 + $0x48] sm:$0xff] %v809_v31  ;;  %1102 = vst [vmem:[%s1885_s23 + $0x58] sm:$0xff] %v898_v33 }
 0x1f5   : > { %v813_v35 = vpop.f32.mrf.mxu1  ;;  %v902_v37 = vpop.f32.mrf.mxu0 }
 0x1f6   : > { %1107 = vst [vmem:[%s1885_s23 + $0x80] sm:$0xff] %v813_v35  ;;  %1109 = vst [vmem:[%s1885_s23 + $0x90] sm:$0xff] %v902_v37 }
 0x1f7   : > { %v815_v38 = vpop.f32.mrf.mxu1  ;;  %v904_v40 = vpop.f32.mrf.mxu0 }
 0x1f8   : > { %1108 = vst [vmem:[%s1885_s23 + $0x88] sm:$0xff] %v815_v38  ;;  %1110 = vst [vmem:[%s1885_s23 + $0x98] sm:$0xff] %v904_v40 }
 0x1fb   : > { %v819_v43 = vpop.f32.mrf.mxu1  ;;  %v908_v45 = vpop.f32.mrf.mxu0 }
 0x1fc   : > { %1115 = vst [vmem:[%s1885_s23 + $0xc0] sm:$0xff] %v819_v43  ;;  %1117 = vst [vmem:[%s1885_s23 + $0xd0] sm:$0xff] %v908_v45 }
 0x1fd   : > { %v821_v47 = vpop.f32.mrf.mxu1  ;;  %v910_v49 = vpop.f32.mrf.mxu0 }
 0x1fe   : > { %1116 = vst [vmem:[%s1885_s23 + $0xc8] sm:$0xff] %v821_v47  ;;  %1118 = vst [vmem:[%s1885_s23 + $0xd8] sm:$0xff] %v910_v49 }
 0x230   : > { %v979_v52 = vpop.f32.mrf.mxu1 }
 0x231   : > { %1095 = vst [vmem:[%s1885_s23 + $0x20] sm:$0xff] %v979_v52  ;;  %v1068_v55 = vpop.f32.mrf.mxu0 }
 0x232   : > { %1097 = vst [vmem:[%s1885_s23 + $0x30] sm:$0xff] %v1068_v55  ;;  %v981_v58 = vpop.f32.mrf.mxu1 }
 0x233   : > { %1096 = vst [vmem:[%s1885_s23 + $0x28] sm:$0xff] %v981_v58  ;;  %v1070_v60 = vpop.f32.mrf.mxu0 }
 0x234   : > { %1098 = vst [vmem:[%s1885_s23 + $0x38] sm:$0xff] %v1070_v60 }
 0x235   : > { %v985_v0 = vpop.f32.mrf.mxu1 }
 0x236   : > { %1103 = vst [vmem:[%s1885_s23 + $0x60] sm:$0xff] %v985_v0  ;;  %v1074_v3 = vpop.f32.mrf.mxu0 }
 0x237   : > { %1105 = vst [vmem:[%s1885_s23 + $0x70] sm:$0xff] %v1074_v3  ;;  %v987_v6 = vpop.f32.mrf.mxu1 }
 0x238   : > { %1104 = vst [vmem:[%s1885_s23 + $0x68] sm:$0xff] %v987_v6  ;;  %v1076_v10 = vpop.f32.mrf.mxu0 }
 0x239   : > { %1106 = vst [vmem:[%s1885_s23 + $0x78] sm:$0xff] %v1076_v10 }
 0x23a   : > { %v991_v14 = vpop.f32.mrf.mxu1 }
 0x23b   : > { %1111 = vst [vmem:[%s1885_s23 + $0xa0] sm:$0xff] %v991_v14 }
 0x23c   : > { %v993_v18 = vpop.f32.mrf.mxu1 }
 0x23d   : > { %1112 = vst [vmem:[%s1885_s23 + $0xa8] sm:$0xff] %v993_v18 }
 0x23e   : > { %v997_v21 = vpop.f32.mrf.mxu1 }
 0x23f   : > { %1119 = vst [vmem:[%s1885_s23 + $0xe0] sm:$0xff] %v997_v21 }
 0x240   : > { %v999_v24 = vpop.f32.mrf.mxu1 }
 0x241   : > { %1120 = vst [vmem:[%s1885_s23 + $0xe8] sm:$0xff] %v999_v24 }
 0x272   : > { %v1080_v30 = vpop.f32.mrf.mxu1 }
 0x273   : > { %1113 = vst [vmem:[%s1885_s23 + $0xb0] sm:$0xff] %v1080_v30 }
 0x274   : > { %v1082_v34 = vpop.f32.mrf.mxu1 }
 0x275   : > { %1114 = vst [vmem:[%s1885_s23 + $0xb8] sm:$0xff] %v1082_v34 }
 0x276   : > { %v1086_v8 = vpop.f32.mrf.mxu1 }
 0x277   : > { %1121 = vst [vmem:[%s1885_s23 + $0xf0] sm:$0xff] %v1086_v8 }
 0x278   : > { %v1088_v41 = vpop.f32.mrf.mxu1 }
 0x279   : > { %1122 = vst [vmem:[%s1885_s23 + $0xf8] sm:$0xff] %v1088_v41 }
 0x27a PF: > { %s15_s15 = sadd.s32 1, %s1405_s15  }
 0x27b   : > { %p12_p1 = scmp.ge.s32.totalorder %s15_s15, 4  }
 0x27d   :  { %14 = sbr.rel (!%p12_p1) target bundleno = 1 (0x1), region = 71 }
 0x282   :  { %1144 = vsyncpa [#allocation3], 1 }
 0x283   :  { %1146 = vsyncpa [#allocation3 + $0x1], 1 }

</bundles_post_ra>
